<compile_context>
chip_gen: v7x
topology: tpu7x:2x2x1
jax: 0.10.0
libtpu: 0.0.40
codegen_flags: <defaults>
</compile_context>

<pallas_src>
import jax
import jax.numpy as jnp
from jax.experimental import pallas as pl
from jax.experimental.pallas import tpu as pltpu

_LANE = 128
_SUBLANE = 8


def _sumsq_partial_kernel(x_ref, out_ref):
    """Per-tile partial sum of squares; one SMEM scalar per grid step."""
    t = x_ref[...]                      # (tile_rows, 128) f32, contiguous slab
    out_ref[0, 0] = jnp.sum(t * t)      # VPU square + XLU reduce (mem-bound)


def _mean_of_squares(vec, n_true, *, max_tile_rows=4096):
    """mean(vec[:n_true]**2); vec is zero-padded past n_true so padding is exact."""
    n = vec.shape[0]
    rows = -(-n // _LANE)                         # ceil(N / 128)
    rows = -(-rows // _SUBLANE) * _SUBLANE        # round rows up to multiple of 8
    tr = min(int(max_tile_rows), rows)            # tile rows (multiple of 8)
    rows_final = -(-rows // tr) * tr              # total rows, multiple of tr
    total = rows_final * _LANE
    if total != n:
        vec = jnp.pad(vec, (0, total - n))        # zeros -> zero contribution
    mat = vec.reshape(rows_final, _LANE)          # row-major: each tile contiguous
    num_tiles = rows_final // tr

    partials = pl.pallas_call(
        _sumsq_partial_kernel,
        out_shape=jax.ShapeDtypeStruct((1, num_tiles), jnp.float32),
        grid_spec=pltpu.PrefetchScalarGridSpec(
            num_scalar_prefetch=0,
            grid=(num_tiles,),
            in_specs=[pl.BlockSpec((tr, _LANE), lambda i: (i, 0))],
            out_specs=pl.BlockSpec((1, 1), lambda i: (0, i),
                                   memory_space=pltpu.SMEM),
        ),
        compiler_params=pltpu.CompilerParams(
            dimension_semantics=("parallel",)),   # independent tiles -> dual-TC on v7x
    )(mat)
    return jnp.sum(partials) / jnp.float32(n_true)


def bc_loss_forward(inputs, model_estimation, *, max_tile_rows=4096):
    """JAX/Pallas equivalent of BCLoss.forward(inputs, model_estimation)."""
    x = inputs[:, 0].astype(jnp.float32)
    y = inputs[:, 1].astype(jnp.float32)
    z = inputs[:, 2].astype(jnp.float32)

    # TODO(synk): torch.autograd.grad through the arbitrary model_estimation
    # callable has no in-kernel Pallas equivalent; gradients use jax.grad and
    # only the residual reduction runs in the Pallas kernel.
    def sum_real(a, b, c):
        return jnp.sum(jnp.real(model_estimation(a, b, c)))

    def sum_imag(a, b, c):
        return jnp.sum(jnp.imag(model_estimation(a, b, c)))

    gxr, gyr, gzr = jax.grad(sum_real, argnums=(0, 1, 2))(x, y, z)
    gxi, gyi, gzi = jax.grad(sum_imag, argnums=(0, 1, 2))(x, y, z)

    # bc_res_i = x_i*(dxr+dxi) + y_i*(dyr+dyi) + z_i*(dzr+dzi)   (real-valued)
    # One fused elementwise here (replaces the stack writes the previous
    # version already paid for); the kernel only streams this dense vector.
    bc = x * (gxr + gxi) + y * (gyr + gyi) + z * (gzr + gzi)

    return _mean_of_squares(bc, x.shape[0], max_tile_rows=max_tile_rows)


if __name__ == "__main__":
    key = jax.random.PRNGKey(0)
    M = 8  # u has shape (N, M)

    def model_estimation(x, y, z):
        # small analytic complex-valued "network": u[i, m] depends on x_i, y_i, z_i
        freqs = jnp.arange(1, M + 1, dtype=jnp.float32)
        phase = (x[:, None] * freqs + y[:, None] * (0.5 * freqs)
                 + z[:, None] * (0.25 * freqs))
        amp = 1.0 + 0.1 * jnp.sin(x + y + z)
        return (amp[:, None] * jnp.exp(1j * phase)).astype(jnp.complex64)

    def reference(inputs):
        # plain-JAX reference mirroring the torch math
        x, y, z = inputs[:, 0], inputs[:, 1], inputs[:, 2]
        gxr, gyr, gzr = jax.grad(
            lambda a, b, c: jnp.sum(model_estimation(a, b, c).real), (0, 1, 2))(x, y, z)
        gxi, gyi, gzi = jax.grad(
            lambda a, b, c: jnp.sum(model_estimation(a, b, c).imag), (0, 1, 2))(x, y, z)
        bc = x * (gxr + gxi) + y * (gyr + gyi) + z * (gzr + gzi)
        return jnp.mean(jnp.abs(bc) ** 2)

    k1, k2 = jax.random.split(key)

    # main config: N = 300 collocation points -> single-tile grid
    inputs = jax.random.normal(k1, (300, 3), dtype=jnp.float32)
    loss = bc_loss_forward(inputs, model_estimation)
    jax.block_until_ready(loss)
    ref = reference(inputs)
    assert jnp.allclose(loss, ref, rtol=1e-5, atol=1e-6), (loss, ref)

    # multi-tile coverage: N = 2000 with a forced small tile -> parallel grid of 2
    inputs2 = jax.random.normal(k2, (2000, 3), dtype=jnp.float32)
    loss2 = bc_loss_forward(inputs2, model_estimation, max_tile_rows=8)
    jax.block_until_ready(loss2)
    ref2 = reference(inputs2)
    assert jnp.allclose(loss2, ref2, rtol=1e-5, atol=1e-6), (loss2, ref2)

    print("KERNEL_OK")
</pallas_src>

<mosaic_0001>
module attributes {stable_mosaic.version = 11 : i64} {
  func.func @_sumsq_partial_kernel(%arg0: i32, %arg1: memref<8x128xf32, #tpu.memory_space<vmem>>, %arg2: memref<1x1xf32, #tpu.memory_space<smem>>) attributes {dimension_semantics = [#tpu.dimension_semantics<parallel>], iteration_bounds = array<i64: 1>, scalar_prefetch = 0 : i64, scratch_operands = 0 : i64, tpu.core_type = #tpu.core_type<tc>, window_params = [{transform_indices = @transform_0, window_bounds = array<i64: 8, 128>}, {transform_indices = @transform_1, window_bounds = array<i64: 1, 1>}]} {
    %c0 = arith.constant 0 : index
    %c0_0 = arith.constant 0 : index
    %0 = vector.load %arg1[%c0, %c0_0] : memref<8x128xf32, #tpu.memory_space<vmem>>, vector<8x128xf32>
    %1 = arith.mulf %0, %0 : vector<8x128xf32>
    %2 = vector.shape_cast %1 : vector<8x128xf32> to vector<1x8x128xf32>
    %cst = arith.constant dense<0.000000e+00> : vector<1xf32>
    %3 = vector.multi_reduction <add>, %2, %cst [1, 2] : vector<1x8x128xf32> to vector<1xf32>
    %4 = vector.shape_cast %3 : vector<1xf32> to vector<1x1x1xf32>
    %5 = vector.extract %4[0, 0, 0] : f32 from vector<1x1x1xf32>
    %c0_1 = arith.constant 0 : index
    %c0_2 = arith.constant 0 : index
    %6 = memref.load %arg2[%c0_1, %c0_2] : memref<1x1xf32, #tpu.memory_space<smem>>
    memref.store %5, %arg2[%c0_1, %c0_2] : memref<1x1xf32, #tpu.memory_space<smem>>
    return
  }
  func.func @transform_0(%arg0: i32) -> (i32, i32) {
    %c0_i32 = arith.constant 0 : i32
    %c0_i32_0 = arith.constant 0 : i32
    return %arg0, %c0_i32 : i32, i32
  }
  func.func @transform_1(%arg0: i32) -> (i32, i32) {
    %c0_i32 = arith.constant 0 : i32
    %c0_i32_0 = arith.constant 0 : i32
    return %c0_i32, %arg0 : i32, i32
  }
}

</mosaic_0001>

<bundles_post_ra>
// kernel: tpu_custom_call.1
= control target key start
LH: loop header
LB: loop body
LE: loop exit
PB: predicated region body
PF: predicated region fallthrough
CT: control target
= control target key end

     0   :  { %6 = vsyncpa [#allocation3], 0  ;;  %s124_s0 = inlined_call_operand.hbm [shape: f32[8,128], index: 0, kind: input, shape index: {}]   ;;  %s125_s1 = inlined_call_operand.hbm [shape: f32[1,1], index: 1, kind: output, shape index: {}]  }
   0x1   :  { %7 = vsyncpa [#allocation4], 0  ;;  %s88_s6 = smov [#allocation2]   ;;  %s52_s10 = scalar_lea.hbm %s124_s0, 128 }
   0x2   :  { %s14_s7 = sshll.u32 %s88_s6, 4  ;;  %p53_p0 = scmp.ne.s32.totalorder %s124_s0, %s52_s10  ;;  %s15_s7 = int_to_ptr.vmem [resolvable:$true] %s14_s7 }
   0x3   :  { %p56_p1 = scmp.lt.u32.totalorder %s52_s10, %s124_s0 }
   0x5   :  { %p58_p2 = pnand %p56_p1, %p53_p0 }
   0x7   :  { %61 = shalt.err (!%p58_p2)
}
   0x8   :  { %s62_s15 = scalar_lea.vmem %s15_s7, 128  ;;  %p67_p4 = scmp.lt.s32.totalorder %s15_s7, %s15_s7 }
   0x9   :  { %p63_p3 = scmp.ne.s32.totalorder %s15_s7, %s62_s15  ;;  %p68_p5 = scmp.lt.s32.totalorder %s62_s15, %s62_s15 }
   0xb   :  { %p69_p6 = por %p68_p5, %p67_p4 }
   0xd   :  { %p70_p7 = pnand %p69_p6, %p63_p3 }
   0xf   :  { %73 = shalt.err (!%p70_p7)
}
  0x10   :  { %17 = dma.hbm_to_vmem [thread:$0]  %s124_s0, 128, %s15_s7, [#allocation3]  }
  0x11   :  { %84 = dma.done.wait [#allocation3], 128  }
  0x12   :  { %85 = vsyncadd [#allocation3], 4294967168  ;;  %v21_v0 = vld [vmem:[#allocation2] sm:$0xff]  ;;  %s74_s21 = scalar_lea.hbm %s125_s1, 16 }
  0x13   :  { %v22_v1 = vmul.f32 %v21_v0, %v21_v0  ;;  %p75_p8 = scmp.ne.s32.totalorder %s125_s1, %s74_s21  ;;  %p78_p9 = scmp.lt.u32.totalorder %s74_s21, %s125_s1 }
  0x15   :  { %23 = vadd.xlane.f32.xlu0 %v22_v1  ;;  %p80_p10 = pnand %p78_p9, %p75_p8 }
  0xa2   :  { %v24_v2 = vpop.xlane.xlu0 %23 }
  0xa3   :  { %v25_v3 = vrot.slane %v24_v2, 4 }
  0xa5   :  { %v26_v4 = vadd.f32 %v25_v3, %v24_v2 }
  0xa7   :  { %v27_v5 = vrot.slane %v26_v4, 2 }
  0xa9   :  { %v28_v6 = vadd.f32 %v27_v5, %v26_v4 }
  0xab   :  { %v29_v7 = vrot.slane %v28_v6, 1 }
  0xad   :  { %v30_v8 = vadd.f32 %v29_v7, %v28_v6 }
  0xaf   :  { %48 = vpush %v30_v8 }
  0xe0   :  { %s49_s18 = spop %48 }
  0xe1   :  { %33 = sst [smem:[#allocation5]] %s49_s18 }
  0xe2   :  { %83 = shalt.err (!%p80_p10)
}
  0xe3   :  { %s89_s25 = smov [#allocation5]  }
  0xe4   :  { %41 = dma.smem_to_hbm %s89_s25, 16, %s125_s1, [#allocation4]  }
  0xe5   :  { %86 = dma.done.wait [#allocation4], 16  }
  0xe6   :  { %87 = vsyncadd [#allocation4], 4294967280 }
  0xe7   :  { %45 = sfence }
  0xe8   :  { %46 = vsyncpa [#allocation3], 1 }
  0xe9   :  { %47 = vsyncpa [#allocation4], 1 }

</bundles_post_ra>
